<compile_context>
chip_gen: v7x
topology: tpu7x:2x2x1
jax: 0.10.0
libtpu: 0.0.40
codegen_flags: <defaults>
</compile_context>

<pallas_src>
import functools

import jax
import jax.numpy as jnp
from jax.experimental import pallas as pl
from jax.experimental.pallas import tpu as pltpu


def _pick_tile(hw, max_tile):
    """Lane-axis pixel tile: multiple of 128, dividing hw when possible (no pad)."""
    max_tile = max(128, (int(max_tile) // 128) * 128)
    if hw <= max_tile:
        return ((hw + 127) // 128) * 128            # single (possibly ragged) tile
    if hw % 128 == 0:
        q = hw // 128
        for d in range(max_tile // 128, 7, -1):     # accept tiles >= 1024 lanes
            if q % d == 0:
                return d * 128
    return max_tile                                 # ragged last tile, masked in-kernel


def _pick_chunk(tile, max_chunk):
    """In-kernel vreg chunk: multiple of 128 that divides the tile."""
    q = tile // 128
    for d in range(max(1, min(int(max_chunk) // 128, q)), 0, -1):
        if q % d == 0:
            return d * 128
    return 128


def _focal_kernel(pred_ref, target_ref, cent_p_ref, cent_l_ref, nsq_s_ref, *rest,
                  gamma, has_mask, valid_hw, tile, chunk):
    """One (batch, pixel-tile) grid step.  Pixels on lanes, classes on sublanes.

    The HBM->VMEM tile is large (good DMA granularity); compute walks it in
    `chunk`-lane slices with static offsets so the (K, chunk) intermediates
    stay in vregs instead of spilling to VMEM.
    """
    if has_mask:
        mask_ref, loss_out_ref, cnt_out_ref = rest
    else:
        (loss_out_ref,) = rest
        mask_ref = cnt_out_ref = None

    cent_p = cent_p_ref[...]          # (K, C)  -2 * centroid / 255
    cent_l = cent_l_ref[...]          # (K, C)  -2 * centroid / 255**2
    nsq_s = nsq_s_ref[...]            # (K, 1)  ||centroid / 255||^2
    k_dim = cent_p.shape[0]

    nchunks = tile // chunk
    tile_base = pl.program_id(1) * tile if valid_hw is not None else None

    loss_acc = jnp.float32(0.0)
    cnt_acc = jnp.float32(0.0)

    for ci in range(nchunks):                       # static offsets -> plain vreg loads
        c0 = ci * chunk
        pred_c = pred_ref[:, c0:c0 + chunk]         # (C, chunk)
        tgt_c = target_ref[:, c0:c0 + chunk]        # (C, chunk)
        msk = mask_ref[:, c0:c0 + chunk] if has_mask else None   # (1, chunk)

        valid = None
        if valid_hw is not None:
            # Ragged last tile: lanes past `hw` hold whatever the DMA left there
            # (possibly NaN/Inf) -> zero the *inputs* before any sqrt/exp/log so
            # garbage cannot poison the partial sums (NaN * 0 == NaN).
            lane = jax.lax.broadcasted_iota(jnp.int32, (1, chunk), 1)
            valid = (tile_base + c0 + lane) < valid_hw
            pred_c = jnp.where(valid, pred_c, 0.0)
            tgt_c = jnp.where(valid, tgt_c, 0.0)
            if has_mask:
                msk = jnp.where(valid, msk, 0.0)

        # round(target * 255) folded in-kernel (no materialized label array).
        label_c = jnp.round(tgt_c * 255.0)          # (C, chunk)

        # Cross terms on the MXU: (K, C) @ (C, chunk).  The -2 (and /255 for the
        # label path) is pre-folded into the LHS in the wrapper.
        cross_p = jnp.dot(cent_p, pred_c, preferred_element_type=jnp.float32)
        cross_l = jnp.dot(cent_l, label_c, preferred_element_type=jnp.float32)
        pp = jnp.sum(pred_c * pred_c, axis=0, keepdims=True)      # (1, chunk)

        # ||p - mu/255||^2 (expanded form can go slightly negative -> clamp).
        d2 = jnp.maximum(pp + cross_p + nsq_s, 0.0)               # (K, chunk)
        # quasi = 1 / (||p - mu/255|| + 1e-8); single accurate EUP rsqrt pass.
        # Differs from the reference only when a distance is ~1e-8, where the
        # softmax is already saturated.
        quasi = jax.lax.rsqrt(d2 + 1e-16)                         # (K, chunk)

        # label_to_classes: nearest centroid of round(target*255); first index
        # wins on ties.  ||l||^2 term dropped (argmin only); scaled to [0,1]^C.
        cost_l = cross_l + nsq_s                                  # (K, chunk)
        iota_k = jax.lax.broadcasted_iota(jnp.int32, (k_dim, chunk), 0)
        cmin = jnp.min(cost_l, axis=0, keepdims=True)
        tgt_idx = jnp.min(jnp.where(cost_l <= cmin, iota_k, k_dim),
                          axis=0, keepdims=True)
        onehot = (iota_k == tgt_idx).astype(jnp.float32)          # (K, chunk)

        # Softmax over classes (sublane axis); only the target column is needed.
        m = jnp.max(quasi, axis=0, keepdims=True)                 # (1, chunk)
        e = jnp.exp(quasi - m)                                    # (K, chunk)
        denom = jnp.sum(e, axis=0, keepdims=True)                 # (1, chunk)

        if gamma != 0.0:
            e_t = jnp.sum(e * onehot, axis=0, keepdims=True)      # (1, chunk)
            # Exact divide on the small (1, chunk) column keeps pt close to the
            # torch reference (cheap: 1/K of the elements).
            pt = e_t / denom + 1e-8
            one_minus = 1.0 - pt
            ig = int(gamma)
            if float(gamma) == float(ig) and 0 < ig <= 8:
                w = one_minus
                for _ in range(ig - 1):
                    w = w * one_minus
            else:
                w = jnp.power(one_minus, gamma)
            loss = -w * jnp.log(pt)                               # (1, chunk)
        else:
            # NB: gamma==0 is exact -log_softmax (no +1e-8), matching the
            # reference's separate NLL branch (intentionally not continuous
            # with the gamma!=0 branch).
            q_t = jnp.sum(quasi * onehot, axis=0, keepdims=True)
            loss = -(q_t - m - jnp.log(denom))                    # (1, chunk)

        if has_mask:
            loss = loss * msk
            cnt_acc = cnt_acc + jnp.sum(msk)
        elif valid_hw is not None:
            loss = loss * valid.astype(jnp.float32)

        loss_acc = loss_acc + jnp.sum(loss)

    # Per-(batch, tile) partial sums, stored lane-dense; reduced in JAX outside.
    loss_out_ref[...] = jnp.full((1, 1, 1, 128), loss_acc, dtype=jnp.float32)
    if has_mask:
        cnt_out_ref[...] = jnp.full((1, 1, 1, 128), cnt_acc, dtype=jnp.float32)


def focal_ce_grid_to_seg(pred, target, cls_centroids, select_mask=None,
                         focal_gamma=2.0, reduction="mean",
                         tile_hw=32768, chunk_hw=1024):
    """pred, target: (B, C, H, W) float32 NCHW.  cls_centroids: (K, C) in 0..255."""
    pred = pred.astype(jnp.float32)
    target = target.astype(jnp.float32)
    b, c, h, w = pred.shape
    k = int(cls_centroids.shape[0])
    hw = h * w
    n = b * hw

    tile = _pick_tile(hw, tile_hw)
    chunk = _pick_chunk(tile, chunk_hw)
    nt = pl.cdiv(hw, tile)
    # Ragged last tile -> mask inputs in-kernel (no jnp.pad pass over HBM).
    valid_hw = hw if hw % tile != 0 else None

    # NCHW -> (B, C, H*W): free reshape, no HBM transpose; pixels land on lanes.
    pred_p = pred.reshape(b, c, hw)
    target_p = target.reshape(b, c, hw)

    has_mask = select_mask is not None
    if has_mask:
        # Reference asserts select_mask is channel-consistent, so channel 0 IS the
        # per-pixel mask (no jnp.all pass over the full (B, C, H, W) bool tensor).
        # TODO(synk): the channel-consistency assert itself is not checked here.
        # TODO(synk): stream the mask as int8/bool (4x less mask bandwidth) once
        # single-sublane narrow-dtype blocks are validated on all target chips.
        mask_f = select_mask[:, 0].reshape(b, 1, hw).astype(jnp.float32)
    # TODO(synk): valid_imgs / discard_empty masking branch not implemented.
    # TODO(synk): accepting pre-quantized uint8 targets (or precomputed class ids)
    # from the producer would halve streamed bytes on v5e; not possible in-script.

    # Centroid constants (tiny): fold -2 (and the /255 of the label path) into
    # the matmul LHS so the kernel computes pp + cross + nsq directly.
    cent = cls_centroids.astype(jnp.float32).reshape(k, c)
    cent_s = cent * (1.0 / 255.0)
    cent_p = -2.0 * cent_s                        # (K, C) pred cross-term LHS
    cent_l = cent_p * (1.0 / 255.0)               # (K, C) label cross-term LHS
    nsq_s = jnp.sum(cent_s * cent_s, axis=1, keepdims=True)     # (K, 1)

    kernel = functools.partial(_focal_kernel, gamma=float(focal_gamma),
                               has_mask=has_mask, valid_hw=valid_hw,
                               tile=tile, chunk=chunk)

    in_specs = [
        pl.BlockSpec((None, c, tile), lambda bi, ji: (bi, 0, ji)),   # pred
        pl.BlockSpec((None, c, tile), lambda bi, ji: (bi, 0, ji)),   # target
        pl.BlockSpec((k, c), lambda bi, ji: (0, 0)),                 # -2*cent/255
        pl.BlockSpec((k, c), lambda bi, ji: (0, 0)),                 # -2*cent/255^2
        pl.BlockSpec((k, 1), lambda bi, ji: (0, 0)),                 # ||cent/255||^2
    ]
    args = [pred_p, target_p, cent_p, cent_l, nsq_s]
    if has_mask:
        in_specs.append(pl.BlockSpec((None, 1, tile), lambda bi, ji: (bi, 0, ji)))
        args.append(mask_f)

    out_shape = [jax.ShapeDtypeStruct((b, nt, 1, 128), jnp.float32)]
    out_specs = [pl.BlockSpec((1, 1, 1, 128), lambda bi, ji: (bi, ji, 0, 0))]
    if has_mask:   # selected-pixel count as a second lane-dense partial output
        out_shape.append(jax.ShapeDtypeStruct((b, nt, 1, 128), jnp.float32))
        out_specs.append(pl.BlockSpec((1, 1, 1, 128), lambda bi, ji: (bi, ji, 0, 0)))

    in_bytes = pred_p.size * 4 + target_p.size * 4 + (mask_f.size * 4 if has_mask else 0)
    cost = pl.CostEstimate(
        flops=int(n * (4 * k * c + 16 * k + 10 * c + 32)),
        transcendentals=int(n * (2 * k + 4)),
        bytes_accessed=int(in_bytes + b * nt * 128 * 4 * len(out_shape)),
    )

    results = pl.pallas_call(
        kernel,
        out_shape=tuple(out_shape),
        grid_spec=pltpu.PrefetchScalarGridSpec(
            num_scalar_prefetch=0,
            grid=(b, nt),
            in_specs=in_specs,
            out_specs=tuple(out_specs),
        ),
        compiler_params=pltpu.CompilerParams(
            dimension_semantics=("parallel", "parallel"),
            # Per-step footprint (double-buffered pred+target+mask tiles) is
            # ~2.5 MiB at tile=32768 -- well inside 32 MiB on v5e/v6e/v7x.
            vmem_limit_bytes=32 * 1024 * 1024),
        cost_estimate=cost,
    )(*args)

    loss_sum = jnp.sum(results[0][:, :, 0, 0])

    if reduction == "sum":
        return loss_sum
    elif reduction == "mean":
        if has_mask:
            count = jnp.sum(results[1][:, :, 0, 0])
            return jnp.where(count > 0, loss_sum / jnp.maximum(count, 1.0),
                             jnp.float32(0.0))
        return loss_sum / jnp.float32(n)
    else:
        # TODO(synk): reduction='none' returns a dynamically-shaped per-selected-
        # pixel vector in the reference; not representable with static Pallas outputs.
        raise NotImplementedError(reduction)


if __name__ == "__main__":
    key = jax.random.PRNGKey(0)
    k1, k2, k3 = jax.random.split(key, 3)

    B, C, H, W, K = 2, 4, 16, 16, 7
    pred = jax.random.uniform(k1, (B, C, H, W), dtype=jnp.float32)
    target = jax.random.uniform(k2, (B, C, H, W), dtype=jnp.float32)
    # Deterministic synthetic class centroids in [0, 255], shape (K, C).
    cls_centroids = (jnp.arange(K * C, dtype=jnp.float32).reshape(K, C) * 9.5) % 256.0

    # Default path: gamma=2, no mask, mean reduction.
    loss = focal_ce_grid_to_seg(pred, target, cls_centroids,
                                focal_gamma=2.0, reduction="mean")
    jax.block_until_ready(loss)

    # Masked + gamma=0 path (exercises the second kernel specialization).
    pix_keep = jax.random.uniform(k3, (B, 1, H, W)) > 0.3
    select_mask = jnp.broadcast_to(pix_keep, (B, C, H, W))
    loss2 = focal_ce_grid_to_seg(pred, target, cls_centroids,
                                 select_mask=select_mask,
                                 focal_gamma=0.0, reduction="sum")
    jax.block_until_ready(loss2)

    print("KERNEL_OK")
</pallas_src>

<mosaic_0001>
module attributes {stable_mosaic.version = 11 : i64} {
  func.func @_focal_kernel(%arg0: i32, %arg1: i32, %arg2: memref<1x4x256xf32, #tpu.memory_space<vmem>>, %arg3: memref<1x4x256xf32, #tpu.memory_space<vmem>>, %arg4: memref<7x4xf32, #tpu.memory_space<vmem>>, %arg5: memref<7x4xf32, #tpu.memory_space<vmem>>, %arg6: memref<7x1xf32, #tpu.memory_space<vmem>>, %arg7: memref<1x1x1x128xf32, #tpu.memory_space<vmem>>) attributes {dimension_semantics = [#tpu.dimension_semantics<parallel>, #tpu.dimension_semantics<parallel>], iteration_bounds = array<i64: 2, 1>, scalar_prefetch = 0 : i64, scratch_operands = 0 : i64, tpu.core_type = #tpu.core_type<tc>, window_params = [{transform_indices = @transform_0, window_bounds = array<i64: 1, 4, 256>}, {transform_indices = @transform_1, window_bounds = array<i64: 1, 4, 256>}, {pipeline_mode = #tpu.pipeline_mode<synchronous>, transform_indices = @transform_2, window_bounds = array<i64: 7, 4>}, {pipeline_mode = #tpu.pipeline_mode<synchronous>, transform_indices = @transform_3, window_bounds = array<i64: 7, 4>}, {pipeline_mode = #tpu.pipeline_mode<synchronous>, transform_indices = @transform_4, window_bounds = array<i64: 7, 1>}, {transform_indices = @transform_5, window_bounds = array<i64: 1, 1, 1, 128>}]} {
    %c0 = arith.constant 0 : index
    %c0_0 = arith.constant 0 : index
    %0 = vector.load %arg4[%c0, %c0_0] : memref<7x4xf32, #tpu.memory_space<vmem>>, vector<7x4xf32>
    %c0_1 = arith.constant 0 : index
    %c0_2 = arith.constant 0 : index
    %1 = vector.load %arg5[%c0_1, %c0_2] : memref<7x4xf32, #tpu.memory_space<vmem>>, vector<7x4xf32>
    %c0_3 = arith.constant 0 : index
    %c0_4 = arith.constant 0 : index
    %2 = vector.load %arg6[%c0_3, %c0_4] : memref<7x1xf32, #tpu.memory_space<vmem>>, vector<7x1xf32>
    %c0_5 = arith.constant 0 : index
    %c0_6 = arith.constant 0 : index
    %c0_7 = arith.constant 0 : index
    %3 = vector.load %arg2[%c0_5, %c0_6, %c0_7] : memref<1x4x256xf32, #tpu.memory_space<vmem>>, vector<1x4x256xf32>
    %4 = vector.shape_cast %3 : vector<1x4x256xf32> to vector<4x256xf32>
    %c0_8 = arith.constant 0 : index
    %c0_9 = arith.constant 0 : index
    %c0_10 = arith.constant 0 : index
    %5 = vector.load %arg3[%c0_8, %c0_9, %c0_10] : memref<1x4x256xf32, #tpu.memory_space<vmem>>, vector<1x4x256xf32>
    %6 = vector.shape_cast %5 : vector<1x4x256xf32> to vector<4x256xf32>
    %cst = arith.constant 2.550000e+02 : f32
    %7 = vector.broadcast %cst : f32 to vector<4x256xf32>
    %8 = arith.mulf %6, %7 : vector<4x256xf32>
    %9 = math.roundeven %8 : vector<4x256xf32>
    %cst_11 = arith.constant dense<0.000000e+00> : vector<7x256xf32>
    %10 = tpu.matmul %0, %4, %cst_11 {dimension_numbers = #tpu.dot_dimension_numbers<[1], [0], [0], [1], [0, 0, 1, 1], [], []>} : vector<7x4xf32>, vector<4x256xf32>, vector<7x256xf32> -> vector<7x256xf32>
    %cst_12 = arith.constant dense<0.000000e+00> : vector<7x256xf32>
    %11 = tpu.matmul %1, %9, %cst_12 {dimension_numbers = #tpu.dot_dimension_numbers<[1], [0], [0], [1], [0, 0, 1, 1], [], []>} : vector<7x4xf32>, vector<4x256xf32>, vector<7x256xf32> -> vector<7x256xf32>
    %12 = arith.mulf %4, %4 : vector<4x256xf32>
    %cst_13 = arith.constant dense<0.000000e+00> : vector<256xf32>
    %13 = vector.multi_reduction <add>, %12, %cst_13 [0] : vector<4x256xf32> to vector<256xf32>
    %14 = vector.shape_cast %13 : vector<256xf32> to vector<1x256xf32>
    %15 = vector.broadcast %14 : vector<1x256xf32> to vector<7x256xf32>
    %16 = arith.addf %15, %10 : vector<7x256xf32>
    %17 = vector.broadcast %2 : vector<7x1xf32> to vector<7x256xf32>
    %18 = arith.addf %16, %17 : vector<7x256xf32>
    %cst_14 = arith.constant 0.000000e+00 : f32
    %19 = vector.broadcast %cst_14 : f32 to vector<7x256xf32>
    %20 = arith.maximumf %18, %19 : vector<7x256xf32>
    %cst_15 = arith.constant 1.000000e-16 : f32
    %21 = vector.broadcast %cst_15 : f32 to vector<7x256xf32>
    %22 = arith.addf %20, %21 : vector<7x256xf32>
    %23 = math.rsqrt %22 : vector<7x256xf32>
    %24 = vector.broadcast %2 : vector<7x1xf32> to vector<7x256xf32>
    %25 = arith.addf %11, %24 : vector<7x256xf32>
    %26 = tpu.iota {dimensions = array<i32: 0>} : vector<7x256xi32>
    %cst_16 = arith.constant dense<0x7F800000> : vector<256xf32>
    %27 = vector.multi_reduction <minimumf>, %25, %cst_16 [0] : vector<7x256xf32> to vector<256xf32>
    %28 = vector.shape_cast %27 : vector<256xf32> to vector<1x256xf32>
    %29 = vector.broadcast %28 : vector<1x256xf32> to vector<7x256xf32>
    %30 = arith.cmpf ole, %25, %29 : vector<7x256xf32>
    %c7_i32 = arith.constant 7 : i32
    %31 = vector.broadcast %c7_i32 : i32 to vector<7x256xi32>
    %32 = arith.select %30, %26, %31 : vector<7x256xi1>, vector<7x256xi32>
    %cst_17 = arith.constant dense<2147483647> : vector<256xi32>
    %33 = vector.multi_reduction <minsi>, %32, %cst_17 [0] : vector<7x256xi32> to vector<256xi32>
    %34 = vector.shape_cast %33 : vector<256xi32> to vector<1x256xi32>
    %35 = vector.broadcast %34 : vector<1x256xi32> to vector<7x256xi32>
    %36 = arith.cmpi eq, %26, %35 : vector<7x256xi32>
    %37 = arith.extui %36 : vector<7x256xi1> to vector<7x256xi32>
    %38 = arith.sitofp %37 : vector<7x256xi32> to vector<7x256xf32>
    %cst_18 = arith.constant dense<0xFF800000> : vector<256xf32>
    %39 = vector.multi_reduction <maximumf>, %23, %cst_18 [0] : vector<7x256xf32> to vector<256xf32>
    %40 = vector.shape_cast %39 : vector<256xf32> to vector<1x256xf32>
    %41 = vector.broadcast %40 : vector<1x256xf32> to vector<7x256xf32>
    %42 = arith.subf %23, %41 : vector<7x256xf32>
    %43 = math.exp %42 : vector<7x256xf32>
    %cst_19 = arith.constant dense<0.000000e+00> : vector<256xf32>
    %44 = vector.multi_reduction <add>, %43, %cst_19 [0] : vector<7x256xf32> to vector<256xf32>
    %45 = vector.shape_cast %44 : vector<256xf32> to vector<1x256xf32>
    %46 = arith.mulf %43, %38 : vector<7x256xf32>
    %cst_20 = arith.constant dense<0.000000e+00> : vector<256xf32>
    %47 = vector.multi_reduction <add>, %46, %cst_20 [0] : vector<7x256xf32> to vector<256xf32>
    %48 = vector.shape_cast %47 : vector<256xf32> to vector<1x256xf32>
    %49 = arith.divf %48, %45 : vector<1x256xf32>
    %cst_21 = arith.constant 9.99999993E-9 : f32
    %50 = vector.broadcast %cst_21 : f32 to vector<1x256xf32>
    %51 = arith.addf %49, %50 : vector<1x256xf32>
    %cst_22 = arith.constant 1.000000e+00 : f32
    %52 = vector.broadcast %cst_22 : f32 to vector<1x256xf32>
    %53 = arith.subf %52, %51 : vector<1x256xf32>
    %54 = arith.mulf %53, %53 : vector<1x256xf32>
    %cst_23 = arith.constant 0.000000e+00 : f32
    %55 = vector.broadcast %cst_23 : f32 to vector<1x256xf32>
    %56 = arith.subf %55, %54 : vector<1x256xf32>
    %57 = math.log %51 : vector<1x256xf32>
    %58 = arith.mulf %56, %57 : vector<1x256xf32>
    %59 = vector.shape_cast %58 : vector<1x256xf32> to vector<1x1x256xf32>
    %cst_24 = arith.constant dense<0.000000e+00> : vector<1xf32>
    %60 = vector.multi_reduction <add>, %59, %cst_24 [1, 2] : vector<1x1x256xf32> to vector<1xf32>
    %61 = vector.shape_cast %60 : vector<1xf32> to vector<1x1x1xf32>
    %62 = vector.extract %61[0, 0, 0] : f32 from vector<1x1x1xf32>
    %cst_25 = arith.constant 0.000000e+00 : f32
    %63 = arith.addf %cst_25, %62 : f32
    %64 = vector.broadcast %63 : f32 to vector<1x1x1x128xf32>
    %c0_26 = arith.constant 0 : index
    %c0_27 = arith.constant 0 : index
    %c0_28 = arith.constant 0 : index
    %c0_29 = arith.constant 0 : index
    %65 = vector.load %arg7[%c0_26, %c0_27, %c0_28, %c0_29] : memref<1x1x1x128xf32, #tpu.memory_space<vmem>>, vector<1x1x1x128xf32>
    tpu.vector_store %arg7[%c0_26, %c0_27, %c0_28, %c0_29], %64 {strides = array<i32>} : memref<1x1x1x128xf32, #tpu.memory_space<vmem>>, vector<1x1x1x128xf32>,
    return
  }
  func.func @transform_0(%arg0: i32, %arg1: i32) -> (i32, i32, i32) {
    %c0_i32 = arith.constant 0 : i32
    %c0_i32_0 = arith.constant 0 : i32
    return %arg0, %c0_i32, %arg1 : i32, i32, i32
  }
  func.func @transform_1(%arg0: i32, %arg1: i32) -> (i32, i32, i32) {
    %c0_i32 = arith.constant 0 : i32
    %c0_i32_0 = arith.constant 0 : i32
    return %arg0, %c0_i32, %arg1 : i32, i32, i32
  }
  func.func @transform_2(%arg0: i32, %arg1: i32) -> (i32, i32) {
    %c0_i32 = arith.constant 0 : i32
    %c0_i32_0 = arith.constant 0 : i32
    %c0_i32_1 = arith.constant 0 : i32
    return %c0_i32, %c0_i32_0 : i32, i32
  }
  func.func @transform_3(%arg0: i32, %arg1: i32) -> (i32, i32) {
    %c0_i32 = arith.constant 0 : i32
    %c0_i32_0 = arith.constant 0 : i32
    %c0_i32_1 = arith.constant 0 : i32
    return %c0_i32, %c0_i32_0 : i32, i32
  }
  func.func @transform_4(%arg0: i32, %arg1: i32) -> (i32, i32) {
    %c0_i32 = arith.constant 0 : i32
    %c0_i32_0 = arith.constant 0 : i32
    %c0_i32_1 = arith.constant 0 : i32
    return %c0_i32, %c0_i32_0 : i32, i32
  }
  func.func @transform_5(%arg0: i32, %arg1: i32) -> (i32, i32, i32, i32) {
    %c0_i32 = arith.constant 0 : i32
    %c0_i32_0 = arith.constant 0 : i32
    %c0_i32_1 = arith.constant 0 : i32
    return %arg0, %arg1, %c0_i32, %c0_i32_0 : i32, i32, i32, i32
  }
}

</mosaic_0001>

<bundles_post_ra>
// kernel: tpu_custom_call.1
= control target key start
LH: loop header
LB: loop body
LE: loop exit
PB: predicated region body
PF: predicated region fallthrough
CT: control target
= control target key end

     0   :  { %10 = vsyncpa [#allocation3], 0  ;;  %s1080_s0 = inlined_call_operand.vmem [shape: f32[2,4,256], index: 0, kind: input, shape index: {}]   ;;  %s1081_s1 = inlined_call_operand.vmem [shape: f32[2,4,256], index: 1, kind: input, shape index: {}]   ;;  %s1082_s2 = inlined_call_operand.vmem [shape: f32[7,4], index: 2, kind: input, shape index: {}]   ;;  %s1083_s3 = inlined_call_operand.vmem [shape: f32[7,4], index: 3, kind: input, shape index: {}]   ;;  %s1084_s4 = inlined_call_operand.vmem [shape: f32[7,1], index: 4, kind: input, shape index: {}]   ;;  %s1085_s5 = inlined_call_operand.hbm [shape: f32[2,1,1,128], index: 5, kind: output, shape index: {}]  }
   0x1   :  { %12 = vsyncpa [#allocation3 + $0x1], 0  ;;  %s936_s18 = smov 0   ;;  %s938_s19 = smov 0  }
   0x2   :  { %s940_s20 = smov 0   ;;  %s942_s21 = smov 0  }
   0x3   :  { %s944_s22 = smov 0   ;;  %s946_s23 = smov 0  }
   0x4 LB: > { %s723_s24 = sadd.s32 4294967295, %s901_s23   ;;  %s724_s25 = sadd.s32 4294967294, %s901_s23   ;;  %s901_s23 = sphi %s946_s23, %s18_s23   ;;  %s897_s22 = sphi %s944_s22, %s1092_s22   ;;  %s893_s21 = sphi %s942_s21, %s1091_s21   ;;  %s889_s20 = sphi %s940_s20, %s1090_s20   ;;  %s885_s19 = sphi %s938_s19, %s1089_s19   ;;  %s881_s18 = sphi %s936_s18, %s1088_s18  }
   0x5   : > { %s30_s26 = sadd.s32 1, %s897_s22  ;;  %s158_s27 = sadd.s32 1, %s889_s20 }
   0x6   : > { %p32_p0 = scmp.ge.s32.totalorder %s30_s26, 2  ;;  %p168_p1 = scmp.ne.s32.totalorder %s889_s20, %s885_s19 }
   0x7   : > { %p169_p2 = scmp.eq.s32.totalorder %s723_s24, 1  ;;  %p174_p3 = scmp.ne.s32.totalorder %s885_s19, %s881_s18 }
   0x8   : > { %s1094_s26 = smov (%p32_p0, %s30_s26), 0  ;;  %p175_p5 = scmp.eq.s32.totalorder %s724_s25, 1 }
   0x9   : > { %p976_p4 = por %p169_p2, %p168_p1  ;;  %s153_s29 = ssub.s32 %s897_s22, %s1094_s26 }
   0xa   : > { %p727_p6 = scmp.ge.s32.totalorder %s901_s23, 1  ;;  %p156_p7 = scmp.eq.s32.totalorder %s153_s29, 0 }
   0xb   : > { %p983_p8 = por %p175_p5, %p174_p3  ;;  %p228_p9 = scmp.lt.s32.totalorder %s901_s23, 3 }
   0xc   : > { %s989_s6 = scalar_select %p156_p7, %s889_s20, %s158_s27  }
   0xd   : > { %p229_p10 = pnand %p727_p6, %p228_p9 }
   0xe   : > { %p269_p11 = scmp.lt.s32.totalorder (!%p229_p10), %s893_s21, 1  ;;  %v903_v0 = vmov (!%p229_p10), 0.0   ;;  %v290_v1 = vld [vmem:[%s1084_s4] sm:$0x7f] (!%p229_p10)  ;;  %v904_v2 = vmov (!%p229_p10), 0   ;;  %vm301_vm0 = vcmask (!%p229_p10), 1043456   ;;  %v490_v49 = vlaneseq (!%p229_p10) }
   0xf   : > { %232 = sbr.rel (%p229_p10) target bundleno = 556 (0x22c), region = 40  ;;  %370 = vmatprep.mubr.f32.mxu0 (!%p229_p10), %v903_v0  ;;  %483 = vmatprep.mubr.f32.mxu1 (!%p229_p10), %v903_v0  ;;  %v288_v7 = vld [vmem:[%s1082_s2] sm:$0x7f] (!%p229_p10)  ;;  %vm297_vm1 = vcmask (!%p229_p10), 31744   ;;  %vm492_vm2 = vcmask (!%p229_p10), 1046528   ;;  %vm605_vm13 = vcmask (!%p229_p10), 1040384  }
  0x10   : > { %805 = vset.pattern.permute.xlu0 (!%p229_p10), %v904_v2  ;;  %v289_v10 = vld [vmem:[%s1083_s3] sm:$0x7f] (!%p229_p10)  ;;  %v491_v54 = vshrl.u32 (!%p229_p10), %v490_v49, 7  ;;  %s266_s29 = sand.u32 (!%p229_p10), 1, %s885_s19  }
  0x11   : > { %399 = vperm.xlu0 (!%p229_p10), %805, %v290_v1   ;;  %s267_s7 = scalar_lea.vmem (!%p229_p10), [#allocation2], %s266_s29  ;;  %s622_s14 = scalar_lea.sflag (!%p229_p10), [#allocation3], %s266_s29 }
  0x12   : > { %s635_s8 = sshll.u32 (!%p229_p10), %s267_s7, 4  ;;  %s1030_s8 = int_to_ptr.vmem [resolvable:$true] %s635_s8 }
  0x13   : > { %s823_s15 = scalar_lea.vmem (!%p229_p10), %s1030_s8, 16 }
  0x14   : > { %p824_p12 = scmp.ne.s32.totalorder (!%p229_p10), %s1030_s8, %s823_s15 }
  0x16   : > { %s270_s9 = scalar_select %p269_p11, %s893_s21, 1 }
  0x17   : > { %p825_p13 = pnand %p824_p12, %p976_p4 }
  0x18   : > { %s743_s10 = sshll.u32 %s270_s9, 3  ;;  %s740_s9 = sshll.u32 %s893_s21, 4 }
  0x19   : > { %s276_s13 = scalar_lea.vmem %s1080_s0, %s743_s10  ;;  %s286_s16 = scalar_lea.vmem %s1081_s1, %s743_s10 }
  0x1a   : > { %v291_v3 = vld [vmem:[%s276_s13] sm:$0xff]  ;;  %s1035_s13 = scalar_lea.hbm %s1085_s5, %s740_s9  ;;  %p826_p0 = pneg %p825_p13 }
  0x1b   : > { %v292_v4 = vld [vmem:[%s286_s16] sm:$0xff]  ;;  %v296_v5 = vcombine.high %v291_v3, %v291_v3  ;;  %v377_v11 = vmul.f32 %v291_v3, %v291_v3  ;;  %s905_s21 = smov [#allocation2]  }
  0x1c   : > { %v293_v6 = vmul.f32 255.0, %v292_v4  ;;  %s827_s16 = sshll.u32 %s905_s21, 4  ;;  %s828_s16 = int_to_ptr.vmem [resolvable:$false] %s827_s16 }
  0x1d   : > { %732 = vmatprep.subr.msk.mxu0 %vm301_vm0, %v296_v5  ;;  %v379_v12 = vcombine.high %v377_v11, %v377_v11  ;;  %v381_v13 = vsel %vm301_vm0, %v377_v11, 0.0  ;;  %s829_s17 = scalar_lea.vmem %s828_s16, 32  ;;  %p830_p1 = scmp.lt.s32.totalorder %s1030_s8, %s828_s16 }
  0x1e   : > { %v745_v8 = vround.rtne.f32 %v293_v6  ;;  %733 = vmatpush1.msk.msra.mxu0 %vm301_vm0, %v291_v3  ;;  %v382_v15 = vrot.slane %v381_v13, 4  ;;  %p831_p2 = scmp.lt.s32.totalorder %s829_s17, %s823_s15 }
  0x1f   : > { %734 = vmatmul.mubr.msk.f32.vlgmr.msra.gmra.mrb[0].mxu0 %vm297_vm1, %v288_v7  ;;  %v388_v14 = vsel %vm301_vm0, %v379_v12, 0.0 }
  0x20   : > { %v411_v9 = vcombine.high %v745_v8, %v745_v8  ;;  %v389_v16 = vrot.slane %v388_v14, 4  ;;  %v383_v17 = vadd.f32 %v382_v15, %v381_v13  ;;  %p832_p3 = por %p831_p2, %p830_p1 }
  0x22   : > { %735 = vmatprep.subr.msk.mxu1 %vm301_vm0, %v411_v9  ;;  %v390_v18 = vadd.f32 %v389_v16, %v388_v14  ;;  %v384_v19 = vrot.slane %v383_v17, 2  ;;  %p833_p5 = pnand %p832_p3, %p826_p0 }
  0x23   : > { %736 = vmatpush1.msk.msra.mxu1 %vm301_vm0, %v745_v8 }
  0x24   : > { %737 = vmatmul.mubr.msk.f32.vlgmr.msra.gmra.mrb[0].mxu1 %vm297_vm1, %v289_v10  ;;  %v391_v20 = vrot.slane %v390_v18, 2  ;;  %v385_v21 = vadd.f32 %v384_v19, %v383_v17 }
  0x26   : > { %v392_v22 = vadd.f32 %v391_v20, %v390_v18  ;;  %v386_v23 = vrot.slane %v385_v21, 1 }
  0x28   : > { %v393_v24 = vrot.slane %v392_v22, 1  ;;  %v387_v25 = vadd.f32 %v386_v23, %v385_v21 }
  0x2a   : > { %v394_v26 = vadd.f32 %v393_v24, %v392_v22 }
  0x90   : > { %v400_v28 = vpop.permute.xlu0 %399 }
  0xf2   : > { %v372_v27 = vpop.f32.mrb[0].mxu0 }
  0xf3   : > { %v395_v29 = vadd.f32 %v387_v25, %v372_v27  ;;  %v374_v30 = vpop.f32.mrb[1].mxu0 }
  0xf4   : > { %v396_v31 = vadd.f32 %v394_v26, %v374_v30 }
  0xf5   : > { %v402_v32 = vadd.f32 %v400_v28, %v395_v29 }
  0xf6   : > { %v403_v33 = vadd.f32 %v400_v28, %v396_v31 }
  0xf7   : > { %v485_v34 = vpop.f32.mrb[0].mxu1  ;;  %v404_v35 = vmax.f32 %v402_v32, 0.0 }
  0xf8   : > { %v486_v36 = vadd.f32 %v485_v34, %v400_v28  ;;  %v487_v37 = vpop.f32.mrb[1].mxu1  ;;  %v405_v38 = vmax.f32 %v403_v33, 0.0 }
  0xf9   : > { %v488_v39 = vadd.f32 %v487_v37, %v400_v28  ;;  %v406_v40 = vadd.f32 1e-16, %v404_v35 }
  0xfa   : > { %v493_v41 = vsel %vm492_vm2, %v486_v36, inf  ;;  %v407_v42 = vadd.f32 1e-16, %v405_v38 }
  0xfb   : > { %v494_v43 = vrot.slane %v493_v41, 4  ;;  %v500_v44 = vsel %vm492_vm2, %v488_v39, inf  ;;  %807 = vrsqrt.f32 %v406_v40 }
  0xfc   : > { %v501_v45 = vrot.slane %v500_v44, 4  ;;  %809 = vrsqrt.f32 %v407_v42 }
  0xfd   : > { %v495_v46 = vmin.f32 %v493_v41, %v494_v43 }
  0xfe   : > { %v502_v47 = vmin.f32 %v500_v44, %v501_v45 }
  0xff   : > { %v496_v48 = vrot.slane %v495_v46, 2 }
 0x100   : > { %v503_v50 = vrot.slane %v502_v47, 2 }
 0x101   : > { %v497_v51 = vmin.f32 %v495_v46, %v496_v48 }
 0x102   : > { %v504_v52 = vmin.f32 %v502_v47, %v503_v50 }
 0x103   : > { %v498_v53 = vrot.slane %v497_v51, 1 }
 0x104   : > { %v505_v55 = vrot.slane %v504_v52, 1 }
 0x105   : > { %v499_v56 = vmin.f32 %v497_v51, %v498_v53  ;;  %v808_v57 = vpop.eup %807 }
 0x106   : > { %v506_v58 = vmin.f32 %v504_v52, %v505_v55  ;;  %v810_v59 = vpop.eup %809  ;;  %v537_v60 = vsel %vm492_vm2, %v808_v57, -inf }
 0x107   : > { %vm507_vm3 = vcmp.le.f32.partialorder %v486_v36, %v499_v56  ;;  %v538_v61 = vrot.slane %v537_v60, 4  ;;  %v544_v62 = vsel %vm492_vm2, %v810_v59, -inf }
 0x108   : > { %v509_v63 = vsel %vm507_vm3, %v491_v54, 7  ;;  %vm508_vm4 = vcmp.le.f32.partialorder %v488_v39, %v506_v58  ;;  %v545_v1 = vrot.slane %v544_v62, 4 }
 0x109   : > { %v511_v2 = vsel %vm492_vm2, %v509_v63, 2147483647  ;;  %v510_v3 = vsel %vm508_vm4, %v491_v54, 7  ;;  %v539_v4 = vmax.f32 %v537_v60, %v538_v61 }
 0x10a   : > { %v512_v5 = vrot.slane %v511_v2, 4  ;;  %v521_v6 = vsel %vm492_vm2, %v510_v3, 2147483647  ;;  %v546_v7 = vmax.f32 %v544_v62, %v545_v1 }
 0x10b   : > { %v522_v8 = vrot.slane %v521_v6, 4  ;;  %v540_v9 = vrot.slane %v539_v4, 2 }
 0x10c   : > { %vm513_vm5 = vcmp.lt.s32.totalorder %v511_v2, %v512_v5  ;;  %v547_v10 = vrot.slane %v546_v7, 2 }
 0x10d   : > { %v514_v11 = vsel %vm513_vm5, %v511_v2, %v512_v5  ;;  %vm523_vm6 = vcmp.lt.s32.totalorder %v521_v6, %v522_v8  ;;  %v541_v12 = vmax.f32 %v539_v4, %v540_v9 }
 0x10e   : > { %v515_v13 = vrot.slane %v514_v11, 2  ;;  %v524_v14 = vsel %vm523_vm6, %v521_v6, %v522_v8  ;;  %v548_v15 = vmax.f32 %v546_v7, %v547_v10 }
 0x10f   : > { %v525_v16 = vrot.slane %v524_v14, 2  ;;  %v542_v17 = vrot.slane %v541_v12, 1 }
 0x110   : > { %vm516_vm7 = vcmp.lt.s32.totalorder %v514_v11, %v515_v13  ;;  %v549_v18 = vrot.slane %v548_v15, 1 }
 0x111   : > { %vm526_vm8 = vcmp.lt.s32.totalorder %v524_v14, %v525_v16  ;;  %v543_v19 = vmax.f32 %v541_v12, %v542_v17  ;;  %v517_v20 = vsel %vm516_vm7, %v514_v11, %v515_v13 }
 0x112   : > { %v550_v21 = vmax.f32 %v548_v15, %v549_v18  ;;  %v527_v22 = vsel %vm526_vm8, %v524_v14, %v525_v16  ;;  %v518_v25 = vrot.slane %v517_v20, 1 }
 0x113   : > { %v551_v23 = vsub.f32 %v808_v57, %v543_v19  ;;  %v528_v27 = vrot.slane %v527_v22, 1 }
 0x114   : > { %v552_v24 = vsub.f32 %v810_v59, %v550_v21  ;;  %vm519_vm9 = vcmp.lt.s32.totalorder %v517_v20, %v518_v25 }
 0x115   : > { %v553_v26 = vmul.f32 1.442695, %v551_v23  ;;  %vm529_vm10 = vcmp.lt.s32.totalorder %v527_v22, %v528_v27  ;;  %v520_v29 = vsel %vm519_vm9, %v517_v20, %v518_v25 }
 0x116   : > { %v555_v28 = vmul.f32 1.442695, %v552_v24  ;;  %v530_v30 = vsel %vm529_vm10, %v527_v22, %v528_v27  ;;  %vm531_vm11 = vcmp.eq.s32.totalorder %v491_v54, %v520_v29 }
 0x117   : > { %811 = vpow2.f32 %v553_v26  ;;  %vm532_vm12 = vcmp.eq.s32.totalorder %v491_v54, %v530_v30  ;;  %v738_v32 = vsel %vm531_vm11, 1.0, %v903_v0 }
 0x118   : > { %813 = vpow2.f32 %v555_v28  ;;  %v739_v35 = vsel %vm532_vm12, 1.0, %v903_v0 }
 0x121   : > { %v812_v31 = vpop.eup %811 }
 0x122   : > { %v814_v33 = vpop.eup %813  ;;  %v571_v34 = vmul.f32 %v812_v31, %v738_v32  ;;  %v557_v36 = vsel %vm492_vm2, %v812_v31, 0.0 }
 0x123   : > { %v572_v37 = vmul.f32 %v814_v33, %v739_v35  ;;  %v558_v38 = vrot.slane %v557_v36, 4  ;;  %v564_v39 = vsel %vm492_vm2, %v814_v33, 0.0 }
 0x124   : > { %v573_v40 = vsel %vm492_vm2, %v571_v34, 0.0  ;;  %v565_v41 = vrot.slane %v564_v39, 4 }
 0x125   : > { %v574_v42 = vrot.slane %v573_v40, 4  ;;  %v580_v43 = vsel %vm492_vm2, %v572_v37, 0.0  ;;  %v559_v44 = vadd.f32 %v558_v38, %v557_v36 }
 0x126   : > { %v581_v45 = vrot.slane %v580_v43, 4  ;;  %v566_v46 = vadd.f32 %v565_v41, %v564_v39 }
 0x127   : > { %v560_v47 = vrot.slane %v559_v44, 2  ;;  %v575_v49 = vadd.f32 %v574_v42, %v573_v40 }
 0x128   : > { %v567_v48 = vrot.slane %v566_v46, 2  ;;  %v582_v0 = vadd.f32 %v581_v45, %v580_v43 }
 0x129   : > { %v561_v50 = vadd.f32 %v560_v47, %v559_v44  ;;  %v576_v54 = vrot.slane %v575_v49, 2 }
 0x12a   : > { %v568_v51 = vadd.f32 %v567_v48, %v566_v46  ;;  %v583_v56 = vrot.slane %v582_v0, 2 }
 0x12b   : > { %v562_v52 = vrot.slane %v561_v50, 1  ;;  %v577_v58 = vadd.f32 %v576_v54, %v575_v49 }
 0x12c   : > { %v569_v53 = vrot.slane %v568_v51, 1  ;;  %v584_v59 = vadd.f32 %v583_v56, %v582_v0 }
 0x12d   : > { %v563_v55 = vadd.f32 %v562_v52, %v561_v50  ;;  %v578_v60 = vrot.slane %v577_v58, 1 }
 0x12e   : > { %v570_v57 = vadd.f32 %v569_v53, %v568_v51  ;;  %v585_v61 = vrot.slane %v584_v59, 1 }
 0x12f   : > { %815 = vrcp.f32 %v563_v55  ;;  %v579_v62 = vadd.f32 %v578_v60, %v577_v58 }
 0x130   : > { %817 = vrcp.f32 %v570_v57  ;;  %v586_v1 = vadd.f32 %v585_v61, %v584_v59 }
 0x139   : > { %v816_v63 = vpop.eup %815 }
 0x13a   : > { %v818_v2 = vpop.eup %817  ;;  %v588_v3 = vmul.f32 %v816_v63, %v579_v62 }
 0x13b   : > { %v590_v4 = vmul.f32 %v818_v2, %v586_v1 }
 0x13c   : > { %v591_v5 = vadd.f32 1e-08, %v588_v3 }
 0x13d   : > { %v592_v6 = vadd.f32 1e-08, %v590_v4 }
 0x13e   : > { %819 = vlog2.f32 %v591_v5  ;;  %v593_v7 = vsub.f32 1.0, %v591_v5 }
 0x13f   : > { %821 = vlog2.f32 %v592_v6  ;;  %v594_v8 = vsub.f32 1.0, %v592_v6 }
 0x140   : > { %v595_v9 = vmul.f32 %v593_v7, %v593_v7 }
 0x141   : > { %v596_v10 = vmul.f32 %v594_v8, %v594_v8 }
 0x142   : > { %v597_v13 = vsub.f32 0.0, %v595_v9 }
 0x143   : > { %v598_v15 = vsub.f32 0.0, %v596_v10 }
 0x148   : > { %v820_v11 = vpop.eup %819 }
 0x149   : > { %v822_v12 = vpop.eup %821  ;;  %v600_v14 = vmul.f32 0.6931472, %v820_v11 }
 0x14a   : > { %v602_v16 = vmul.f32 0.6931472, %v822_v12 }
 0x14b   : > { %v603_v17 = vmul.f32 %v600_v14, %v597_v13 }
 0x14c   : > { %v604_v18 = vmul.f32 %v602_v16, %v598_v15 }
 0x14d   : > { %v606_v19 = vsel %vm605_vm13, %v603_v17, 0.0 }
 0x14e   : > { %v607_v20 = vsel %vm605_vm13, %v604_v18, 0.0 }
 0x14f   : > { %v608_v21 = vadd.f32 %v607_v20, %v606_v19 }
 0x151   : > { %609 = vadd.xlane.f32.xlu0 %v608_v21 }
 0x1de   : > { %v610_v22 = vpop.xlane.xlu0 %609 }
 0x1df   : > { %v611_v23 = vrot.slane %v610_v22, 4 }
 0x1e1   : > { %v612_v24 = vadd.f32 %v611_v23, %v610_v22 }
 0x1e3   : > { %v613_v25 = vrot.slane %v612_v24, 2 }
 0x1e5   : > { %v614_v26 = vadd.f32 %v613_v25, %v612_v24 }
 0x1e7   : > { %v615_v27 = vrot.slane %v614_v26, 1 }
 0x1e9   : > { %v616_v28 = vadd.f32 %v615_v27, %v614_v26 }
 0x1eb   : > { %746 = vpush %v616_v28 }
 0x21c   : > { %s747_s10 = spop %746 }
 0x21d   : > { %v619_v29 = vstv %s747_s10 }
 0x21e   : > { %620 = vst [vmem:[%s267_s7] sm:$0x1] %v619_v29 }
 0x21f   : > { %836 = shalt.err (!%p833_p5)
}
 0x220   : > { %s837_s24 = scalar_lea.hbm %s1035_s13, 16  ;;  %s841_s29 = scalar_lea.hbm %s1085_s5, 32 }
 0x221   : > { %p838_p6 = scmp.ne.s32.totalorder %s1035_s13, %s837_s24  ;;  %p842_p10 = scmp.lt.u32.totalorder %s1035_s13, %s1085_s5 }
 0x222   : > { %p843_p11 = scmp.lt.u32.totalorder %s841_s29, %s837_s24  ;;  %p845_p13 = scmp.lt.u32.totalorder %s837_s24, %s1035_s13 }
 0x223   : > { %p839_p7 = pnand %p838_p6, %p976_p4 }
 0x224   : > { %p844_p12 = por %p843_p11, %p842_p10 }
 0x225   : > { %p840_p9 = pneg %p839_p7 }
 0x226   : > { %p846_p0 = por %p845_p13, %p844_p12 }
 0x228   : > { %p847_p1 = pnand %p846_p0, %p840_p9 }
 0x22a   : > { %850 = shalt.err (!%p847_p1)
}
 0x22b   : > { %748 = dma.vmem_to_hbm [thread:$0]  (%p976_p4), %s1030_s8, 16, %s1035_s13, %s622_s14  }
 0x22c PF: > { %p754_p2 = scmp.ge.s32.totalorder %s901_s23, 2  ;;  %s647_s10 = sand.u32 1, %s881_s18  }
 0x22d   : > { %s648_s11 = scalar_lea.sflag [#allocation3], %s647_s10 }
 0x22e   : > { %p751_p3 = pnand %p754_p2, %p983_p8 }
 0x230   : > { %876 = dma.done.wait (!%p751_p3), %s648_s11, 16  }
 0x231   : > { %878 = vsyncadd (!%p751_p3), %s648_s11, 4294967280  ;;  %s18_s23 = sadd.s32 1, %s901_s23   ;;  %s1088_s18 = smov %s885_s19 }
 0x232   : > { %p15_p5 = scmp.ge.s32.totalorder %s18_s23, 4   ;;  %s1089_s19 = smov %s889_s20 }
 0x233   : > { %s1090_s20 = smov %s989_s6  ;;  %s1091_s21 = smov %s897_s22 }
 0x234   : > { %s1092_s22 = smov %s1094_s26  ;;  %17 = sbr.rel (!%p15_p5) target bundleno = 4 (0x4), region = 78 }
 0x23b   :  { %652 = vsyncpa [#allocation3], 1 }
 0x23c   :  { %654 = vsyncpa [#allocation3 + $0x1], 1 }

</bundles_post_ra>
